<compile_context>
chip_gen: v7x
topology: tpu7x:2x2x1
jax: 0.10.0
libtpu: 0.0.40
codegen_flags: <defaults>
</compile_context>

<pallas_src>
import math

import jax
import jax.numpy as jnp
from jax.experimental import pallas as pl
from jax.experimental.pallas import tpu as pltpu


def _cdiv(a: int, b: int) -> int:
    return -(-a // b)


def _rfe_kernel(x_ref, w_ref, b_ref, o_ref):
    # x_ref: (data_dim, tm)   w_ref: (half, data_dim)   b_ref: (half, 1)
    # o_ref: (2*half, tm)
    x = x_ref[...].astype(jnp.float32)
    w = w_ref[...].astype(jnp.float32)
    b = b_ref[...].astype(jnp.float32)
    half, data_dim = w.shape
    tm = x.shape[1]

    # Linear layer over a K = data_dim contraction: plain VPU FMAs.
    z = jnp.broadcast_to(b, (half, tm))
    for d in range(data_dim):                      # tiny static loop
        z = z + w[:, d : d + 1] * x[d : d + 1, :]

    # cat([cos, sin], dim=channel): two lane-dense, sublane-aligned stores.
    o_ref[:half, :] = jnp.cos(z).astype(o_ref.dtype)
    o_ref[half:, :] = jnp.sin(z).astype(o_ref.dtype)


def _choose_tile(hw: int, out_channels: int, data_dim: int, n_batch: int,
                 budget_bytes: int = 12 << 20, tm_cap: int = 16384) -> int:
    """Lane-dense tile (multiple of 128) sized from a VMEM budget.

    Budget covers the double-buffered streaming blocks (f32 input + output);
    12 MiB keeps us well under the 32 MiB default scoped limit on every
    generation and far below v7x's 64 MiB physical VMEM.
    """
    hw128 = _cdiv(hw, 128) * 128
    per_lane = 4 * 2 * (out_channels + max(data_dim, 8))   # bytes per lane column
    tm = (budget_bytes // per_lane) // 128 * 128
    tm = max(128, min(tm, tm_cap, hw128))
    # v7x has 2 TensorCores: make sure the grid has >= 2 steps when N == 1.
    if n_batch == 1 and tm >= hw128 and hw128 >= 256:
        tm = _cdiv(hw128 // 2, 128) * 128
    return tm


def random_fourier_embedding(x_nchw, weight, bias, *, out_dtype=None):
    """x_nchw: [N, data_dim, H, W]; weight: [half, data_dim]; bias: [half].

    Returns [N, 2*half, H, W] = cat([cos(linear(x)), sin(linear(x))], dim=1).
    """
    N, data_dim, H, W = x_nchw.shape
    half = weight.shape[0]
    out_channels = 2 * half
    HW = H * W
    out_dtype = x_nchw.dtype if out_dtype is None else out_dtype

    tm = _choose_tile(HW, out_channels, data_dim, N)
    hw_pad = _cdiv(HW, tm) * tm

    # Native-NCHW view; reshape is free (no transpose, no extra HBM pass).
    x3 = x_nchw.reshape(N, data_dim, HW)
    if hw_pad != HW:
        # Pad spatial axis so every block is lane-dense; padded lanes are
        # computed (cheap) and sliced off the output below.
        x3 = jnp.pad(x3, ((0, 0), (0, 0), (0, hw_pad - HW)))

    w = weight.astype(jnp.float32)                      # (half, data_dim)
    b = bias.reshape(half, 1).astype(jnp.float32)       # (half, 1)

    cost = pl.CostEstimate(
        flops=2 * N * half * data_dim * HW,
        transcendentals=N * out_channels * HW,
        bytes_accessed=(x_nchw.size * x_nchw.dtype.itemsize
                        + N * out_channels * HW * jnp.dtype(out_dtype).itemsize
                        + w.size * 4 + b.size * 4),
    )

    grid = (N, hw_pad // tm)
    out3 = pl.pallas_call(
        _rfe_kernel,
        out_shape=jax.ShapeDtypeStruct((N, out_channels, hw_pad), out_dtype),
        grid_spec=pltpu.PrefetchScalarGridSpec(
            num_scalar_prefetch=0,
            grid=grid,
            in_specs=[
                pl.BlockSpec((pl.Squeezed(), data_dim, tm), lambda n, j: (n, 0, j)),
                pl.BlockSpec((half, data_dim), lambda n, j: (0, 0)),
                pl.BlockSpec((half, 1), lambda n, j: (0, 0)),
            ],
            out_specs=pl.BlockSpec(
                (pl.Squeezed(), out_channels, tm), lambda n, j: (n, 0, j)
            ),
        ),
        compiler_params=pltpu.CompilerParams(
            dimension_semantics=("parallel", "parallel")
        ),
        cost_estimate=cost,
    )(x3, w, b)

    if hw_pad != HW:
        out3 = out3[..., :HW]
    return out3.reshape(N, out_channels, H, W)


def _reference(x_nchw, weight, bias):
    # Pure-JAX f32 reference of the PyTorch forward.
    out = (weight[None, :, :, None, None] * x_nchw[:, None, :, :, :]).sum(axis=2)
    out = out + bias[None, :, None, None]
    return jnp.concatenate([jnp.cos(out), jnp.sin(out)], axis=1)


if __name__ == "__main__":
    # Module hyperparameters (small, consistent with the forward pass).
    data_dim = 2          # coordinate dimension (Linear2d -> 1x1 conv over 2 channels)
    out_channels = 32     # must be even
    omega_0 = 1.0
    half = out_channels // 2

    key = jax.random.PRNGKey(0)
    kx, kw, kb = jax.random.split(key, 3)

    # Deterministic parameter init mirroring __init__:
    #   weight ~ Normal(0, 2*pi*omega_0), shape [half, data_dim]
    #   bias   ~ Conv2d default uniform(-1/sqrt(fan_in), 1/sqrt(fan_in)), shape [half]
    weight = (2.0 * math.pi * omega_0) * jax.random.normal(
        kw, (half, data_dim), dtype=jnp.float32
    )
    bound = 1.0 / math.sqrt(data_dim)
    bias = jax.random.uniform(
        kb, (half,), dtype=jnp.float32, minval=-bound, maxval=bound
    )

    # Input coordinates: [N, data_dim, H, W]
    N, H, W = 2, 16, 16
    x = jax.random.uniform(kx, (N, data_dim, H, W), dtype=jnp.float32) * 2.0 - 1.0

    out = random_fourier_embedding(x, weight, bias)
    out = jax.block_until_ready(out)

    ref = _reference(x, weight, bias)
    assert out.shape == (N, out_channels, H, W), out.shape
    assert jnp.allclose(out, ref, atol=1e-5, rtol=1e-5), float(
        jnp.max(jnp.abs(out - ref))
    )

    # Also exercise a non-128-multiple spatial size to validate the padding path.
    H2, W2 = 10, 13
    x2 = jax.random.uniform(kx, (1, data_dim, H2, W2), dtype=jnp.float32) * 2.0 - 1.0
    out2 = jax.block_until_ready(random_fourier_embedding(x2, weight, bias))
    ref2 = _reference(x2, weight, bias)
    assert out2.shape == (1, out_channels, H2, W2), out2.shape
    assert jnp.allclose(out2, ref2, atol=1e-5, rtol=1e-5), float(
        jnp.max(jnp.abs(out2 - ref2))
    )

    print("KERNEL_OK")
</pallas_src>

<mosaic_0001>
module attributes {stable_mosaic.version = 11 : i64} {
  func.func @_rfe_kernel(%arg0: i32, %arg1: i32, %arg2: memref<1x2x256xf32, #tpu.memory_space<vmem>>, %arg3: memref<16x2xf32, #tpu.memory_space<vmem>>, %arg4: memref<16x1xf32, #tpu.memory_space<vmem>>, %arg5: memref<1x32x256xf32, #tpu.memory_space<vmem>>) attributes {dimension_semantics = [#tpu.dimension_semantics<parallel>, #tpu.dimension_semantics<parallel>], iteration_bounds = array<i64: 2, 1>, scalar_prefetch = 0 : i64, scratch_operands = 0 : i64, tpu.core_type = #tpu.core_type<tc>, window_params = [{transform_indices = @transform_0, window_bounds = array<i64: 1, 2, 256>}, {pipeline_mode = #tpu.pipeline_mode<synchronous>, transform_indices = @transform_1, window_bounds = array<i64: 16, 2>}, {pipeline_mode = #tpu.pipeline_mode<synchronous>, transform_indices = @transform_2, window_bounds = array<i64: 16, 1>}, {transform_indices = @transform_3, window_bounds = array<i64: 1, 32, 256>}]} {
    %c0 = arith.constant 0 : index
    %c0_0 = arith.constant 0 : index
    %c0_1 = arith.constant 0 : index
    %0 = vector.load %arg2[%c0, %c0_0, %c0_1] : memref<1x2x256xf32, #tpu.memory_space<vmem>>, vector<1x2x256xf32>
    %1 = vector.shape_cast %0 : vector<1x2x256xf32> to vector<2x256xf32>
    %c0_2 = arith.constant 0 : index
    %c0_3 = arith.constant 0 : index
    %2 = vector.load %arg3[%c0_2, %c0_3] : memref<16x2xf32, #tpu.memory_space<vmem>>, vector<16x2xf32>
    %c0_4 = arith.constant 0 : index
    %c0_5 = arith.constant 0 : index
    %3 = vector.load %arg4[%c0_4, %c0_5] : memref<16x1xf32, #tpu.memory_space<vmem>>, vector<16x1xf32>
    %4 = vector.shape_cast %3 : vector<16x1xf32> to vector<16x1xf32>
    %5 = vector.broadcast %4 : vector<16x1xf32> to vector<16x256xf32>
    %6 = vector.extract_strided_slice %2 {offsets = [0, 0], sizes = [16, 1], strides = [1, 1]} : vector<16x2xf32> to vector<16x1xf32>
    %7 = vector.extract_strided_slice %1 {offsets = [0, 0], sizes = [1, 256], strides = [1, 1]} : vector<2x256xf32> to vector<1x256xf32>
    %8 = vector.broadcast %6 : vector<16x1xf32> to vector<16x256xf32>
    %9 = vector.broadcast %7 : vector<1x256xf32> to vector<16x256xf32>
    %10 = arith.mulf %8, %9 : vector<16x256xf32>
    %11 = arith.addf %5, %10 : vector<16x256xf32>
    %12 = vector.extract_strided_slice %2 {offsets = [0, 1], sizes = [16, 1], strides = [1, 1]} : vector<16x2xf32> to vector<16x1xf32>
    %13 = vector.extract_strided_slice %1 {offsets = [1, 0], sizes = [1, 256], strides = [1, 1]} : vector<2x256xf32> to vector<1x256xf32>
    %14 = vector.broadcast %12 : vector<16x1xf32> to vector<16x256xf32>
    %15 = vector.broadcast %13 : vector<1x256xf32> to vector<16x256xf32>
    %16 = arith.mulf %14, %15 : vector<16x256xf32>
    %17 = arith.addf %11, %16 : vector<16x256xf32>
    %18 = math.cos %17 : vector<16x256xf32>
    %c0_6 = arith.constant 0 : index
    %c0_7 = arith.constant 0 : index
    %c0_8 = arith.constant 0 : index
    %19 = vector.load %arg5[%c0_6, %c0_7, %c0_8] : memref<1x32x256xf32, #tpu.memory_space<vmem>>, vector<1x16x256xf32>
    %20 = vector.shape_cast %19 : vector<1x16x256xf32> to vector<16x256xf32>
    %21 = vector.shape_cast %18 : vector<16x256xf32> to vector<1x16x256xf32>
    tpu.vector_store %arg5[%c0_6, %c0_7, %c0_8], %21 {strides = array<i32>} : memref<1x32x256xf32, #tpu.memory_space<vmem>>, vector<1x16x256xf32>,
    %22 = math.sin %17 : vector<16x256xf32>
    %c0_9 = arith.constant 0 : index
    %c16 = arith.constant 16 : index
    %c0_10 = arith.constant 0 : index
    %23 = vector.load %arg5[%c0_9, %c16, %c0_10] : memref<1x32x256xf32, #tpu.memory_space<vmem>>, vector<1x16x256xf32>
    %24 = vector.shape_cast %23 : vector<1x16x256xf32> to vector<16x256xf32>
    %25 = vector.shape_cast %22 : vector<16x256xf32> to vector<1x16x256xf32>
    tpu.vector_store %arg5[%c0_9, %c16, %c0_10], %25 {strides = array<i32>} : memref<1x32x256xf32, #tpu.memory_space<vmem>>, vector<1x16x256xf32>,
    return
  }
  func.func @transform_0(%arg0: i32, %arg1: i32) -> (i32, i32, i32) {
    %c0_i32 = arith.constant 0 : i32
    %c0_i32_0 = arith.constant 0 : i32
    return %arg0, %c0_i32, %arg1 : i32, i32, i32
  }
  func.func @transform_1(%arg0: i32, %arg1: i32) -> (i32, i32) {
    %c0_i32 = arith.constant 0 : i32
    %c0_i32_0 = arith.constant 0 : i32
    %c0_i32_1 = arith.constant 0 : i32
    return %c0_i32, %c0_i32_0 : i32, i32
  }
  func.func @transform_2(%arg0: i32, %arg1: i32) -> (i32, i32) {
    %c0_i32 = arith.constant 0 : i32
    %c0_i32_0 = arith.constant 0 : i32
    %c0_i32_1 = arith.constant 0 : i32
    return %c0_i32, %c0_i32_0 : i32, i32
  }
  func.func @transform_3(%arg0: i32, %arg1: i32) -> (i32, i32, i32) {
    %c0_i32 = arith.constant 0 : i32
    %c0_i32_0 = arith.constant 0 : i32
    return %arg0, %c0_i32, %arg1 : i32, i32, i32
  }
}

</mosaic_0001>

<bundles_post_ra>
// kernel: tpu_custom_call.1
= control target key start
LH: loop header
LB: loop body
LE: loop exit
PB: predicated region body
PF: predicated region fallthrough
CT: control target
= control target key end

     0   :  { %8 = vsyncpa [#allocation3], 0  ;;  %s1955_s0 = inlined_call_operand.vmem [shape: f32[2,2,256], index: 0, kind: input, shape index: {}]   ;;  %s1956_s1 = inlined_call_operand.vmem [shape: f32[16,2], index: 1, kind: input, shape index: {}]   ;;  %s1957_s2 = inlined_call_operand.vmem [shape: f32[16,1], index: 2, kind: input, shape index: {}]   ;;  %s1958_s3 = inlined_call_operand.hbm [shape: f32[2,32,256], index: 3, kind: output, shape index: {}]  }
   0x1   :  { %10 = vsyncpa [#allocation3 + $0x1], 0  ;;  %s1476_s12 = smov 0   ;;  %s1478_s13 = smov 0  }
   0x2   :  { %s1480_s14 = smov 0   ;;  %s1482_s15 = smov 0  }
   0x3   :  { %s1484_s16 = smov 0   ;;  %s1486_s17 = smov 0  }
   0x4 LB: > { %s1217_s18 = sadd.s32 4294967295, %s1443_s17   ;;  %s1218_s19 = sadd.s32 4294967294, %s1443_s17   ;;  %s1443_s17 = sphi %s1486_s17, %s16_s17   ;;  %s1439_s16 = sphi %s1484_s16, %s1969_s16   ;;  %s1435_s15 = sphi %s1482_s15, %s1968_s15   ;;  %s1431_s14 = sphi %s1480_s14, %s1967_s14   ;;  %s1427_s13 = sphi %s1478_s13, %s1966_s13   ;;  %s1423_s12 = sphi %s1476_s12, %s1965_s12  }
   0x5   : > { %s28_s20 = sadd.s32 1, %s1439_s16  ;;  %s107_s21 = sadd.s32 1, %s1431_s14 }
   0x6   : > { %p30_p0 = scmp.ge.s32.totalorder %s28_s20, 2  ;;  %p117_p1 = scmp.ne.s32.totalorder %s1431_s14, %s1427_s13 }
   0x7   : > { %p118_p2 = scmp.eq.s32.totalorder %s1217_s18, 1  ;;  %p123_p3 = scmp.ne.s32.totalorder %s1427_s13, %s1423_s12 }
   0x8   : > { %s1971_s20 = smov (%p30_p0, %s28_s20), 0  ;;  %p124_p5 = scmp.eq.s32.totalorder %s1218_s19, 1 }
   0x9   : > { %p1516_p4 = por %p118_p2, %p117_p1  ;;  %s102_s23 = ssub.s32 %s1439_s16, %s1971_s20 }
   0xa   : > { %p1221_p6 = scmp.ge.s32.totalorder %s1443_s17, 1  ;;  %p105_p7 = scmp.eq.s32.totalorder %s102_s23, 0 }
   0xb   : > { %p1523_p8 = por %p124_p5, %p123_p3  ;;  %p161_p9 = scmp.lt.s32.totalorder %s1443_s17, 3 }
   0xc   : > { %s1529_s25 = scalar_select %p105_p7, %s1431_s14, %s107_s21  }
   0xd   : > { %p162_p10 = pnand %p1221_p6, %p161_p9 }
   0xe   : > { %v203_v0 = vld [vmem:[%s1957_s2] sm:$0xff] (!%p162_p10)  ;;  %v1445_v2 = vmov (!%p162_p10), 0   ;;  %v204_v3 = vld [vmem:[%s1957_s2 + $0x8] sm:$0xff] (!%p162_p10)  ;;  %v1446_v5 = vmov (!%p162_p10), 1   ;;  %p190_p11 = scmp.lt.s32.totalorder (!%p162_p10), %s1435_s15, 1  ;;  %v226_v6 = vlaneseq (!%p162_p10)  ;;  %s186_s18 = sand.u32 (!%p162_p10), 1, %s1427_s13  }
   0xf   : > { %165 = sbr.rel (%p162_p10) target bundleno = 313 (0x139), region = 32  ;;  %v201_v1 = vld [vmem:[%s1956_s1] sm:$0xff] (!%p162_p10)  ;;  %1346 = vset.pattern.permute.xlu1 (!%p162_p10), %v1445_v2  ;;  %1345 = vset.pattern.permute.xlu0 (!%p162_p10), %v1445_v2  ;;  %v202_v4 = vld [vmem:[%s1956_s1 + $0x8] sm:$0xff] (!%p162_p10)  ;;  %s1222_s19 = sshll.u32 (!%p162_p10), %s186_s18, 6 }
  0x10   : > { %207 = vperm.xlu1 (!%p162_p10), %1346, %v203_v0   ;;  %217 = vperm.xlu0 (!%p162_p10), %1345, %v201_v1   ;;  %v227_v7 = vshrl.u32 (!%p162_p10), %v226_v6, 7  ;;  %s1831_s21 = scalar_lea.vmem (!%p162_p10), [#allocation2], %s1222_s19  ;;  %s1263_s23 = sshll.u32 (!%p162_p10), %s1435_s15, 10 }
  0x11   : > { %s1138_s26 = sshll.u32 (!%p162_p10), %s1831_s21, 4  ;;  %s1909_s29 = scalar_lea.sflag (!%p162_p10), [#allocation3], %s186_s18  ;;  %s1902_s26 = int_to_ptr.vmem [resolvable:$true] %s1138_s26 }
  0x12   : > { %v232_v8 = vsub.s32 (!%p162_p10), 2, %v227_v7  ;;  %v228_v11 = vsub.s32 (!%p162_p10), 0, %v227_v7  ;;  %v262_v13 = vsub.s32 (!%p162_p10), 1, %v227_v7  ;;  %v266_v14 = vsub.s32 (!%p162_p10), 3, %v227_v7  ;;  %s1365_s30 = scalar_lea.vmem (!%p162_p10), %s1902_s26, 1024  ;;  %s1453_s4 = smov (!%p162_p10), [#allocation2]  }
  0x13   : > { %p1366_p12 = scmp.ne.s32.totalorder (!%p162_p10), %s1902_s26, %s1365_s30  ;;  %s1369_s5 = sshll.u32 (!%p162_p10), %s1453_s4, 4  ;;  %s1370_s5 = int_to_ptr.vmem [resolvable:$false] %s1369_s5 }
  0x14   : > { %212 = vperm.xlu1 (!%p162_p10), %1346, %v204_v3   ;;  %222 = vperm.xlu0 (!%p162_p10), %1345, %v202_v4   ;;  %s1371_s6 = scalar_lea.vmem (!%p162_p10), %s1370_s5, 2048  ;;  %p1372_p1 = scmp.lt.s32.totalorder (!%p162_p10), %s1902_s26, %s1370_s5 }
  0x15   : > { %p1367_p13 = pnand (!%p162_p10), %p1366_p12, %p1516_p4  ;;  %p1373_p2 = scmp.lt.s32.totalorder (!%p162_p10), %s1371_s6, %s1365_s30 }
  0x16   : > { %s191_s7 = scalar_select %p190_p11, %s1435_s15, 1 }
  0x17   : > { %s1900_s15 = scalar_lea.hbm %s1958_s3, %s1263_s23  ;;  %p1368_p0 = pneg %p1367_p13 }
  0x18   : > { %1348 = vset.pattern.permute.xlu1 %v1446_v5  ;;  %1347 = vset.pattern.permute.xlu0 %v1446_v5  ;;  %s1262_s8 = sshll.u32 %s191_s7, 2  ;;  %v1447_v5 = vmov 683565275   ;;  %p1374_p3 = por %p1373_p2, %p1372_p1 }
  0x19   : > { %257 = vperm.xlu1 %1348, %v202_v4   ;;  %253 = vperm.xlu0 %1347, %v201_v1   ;;  %s197_s11 = scalar_lea.vmem %s1955_s0, %s1262_s8 }
  0x1a   : > { %v200_v9 = vld [vmem:[%s197_s11] sm:$0xf]  ;;  %p1375_p5 = pnand %p1374_p3, %p1368_p0 }
  0x1b   : > { %v233_v10 = vrot.slane %v200_v9, %v232_v8  ;;  %v229_v15 = vrot.slane %v200_v9, %v228_v11  ;;  %v263_v19 = vrot.slane %v200_v9, %v262_v13  ;;  %v267_v20 = vrot.slane %v200_v9, %v266_v14 }
  0x1c   : > { %v1448_v9 = vmov 2475754826  }
  0x1d   : > { %v243_v12 = vrot.slane %v233_v10, %v228_v11  ;;  %v239_v21 = vrot.slane %v229_v15, %v228_v11  ;;  %v273_v27 = vrot.slane %v263_v19, %v262_v13  ;;  %v277_v28 = vrot.slane %v267_v20, %v262_v13 }
  0x1e   : > { %v1449_v11 = vmov 2131351028   ;;  %v1450_v13 = vmov 2102212464   ;;  %v1451_v15 = vmov 920167782  }
  0x8f   : > { %v208_v16 = vpop.permute.xlu1 %207  ;;  %v218_v17 = vpop.permute.xlu0 %217 }
  0x90   : > { %v245_v18 = vmul.f32 %v243_v12, %v218_v17  ;;  %v244_v29 = vmul.f32 %v239_v21, %v218_v17 }
  0x92   : > { %v249_v22 = vadd.f32 %v245_v18, %v208_v16  ;;  %v248_v37 = vadd.f32 %v244_v29, %v208_v16 }
  0x93   : > { %v213_v23 = vpop.permute.xlu1 %212  ;;  %v223_v24 = vpop.permute.xlu0 %222 }
  0x94   : > { %v246_v25 = vmul.f32 %v239_v21, %v223_v24  ;;  %v247_v26 = vmul.f32 %v243_v12, %v223_v24 }
  0x96   : > { %v250_v30 = vadd.f32 %v246_v25, %v213_v23  ;;  %v251_v33 = vadd.f32 %v247_v26, %v213_v23 }
  0x98   : > { %v258_v31 = vpop.permute.xlu1 %257  ;;  %v254_v32 = vpop.permute.xlu0 %253 }
  0x99   : > { %v280_v34 = vmul.f32 %v273_v27, %v258_v31  ;;  %v281_v35 = vmul.f32 %v277_v28, %v258_v31  ;;  %v278_v36 = vmul.f32 %v273_v27, %v254_v32  ;;  %v279_v54 = vmul.f32 %v277_v28, %v254_v32 }
  0x9b   : > { %v1548_v38 = vadd.f32 %v280_v34, %v250_v30  ;;  %v1550_v39 = vadd.f32 %v281_v35, %v251_v33  ;;  %v1552_v40 = vadd.f32 %v278_v36, %v248_v37  ;;  %v1563_v63 = vadd.f32 %v279_v54, %v249_v22 }
  0x9c   : > { %v1452_v22 = vmov 1326507024  }
  0x9d   : > { %v492_v41 = vand.u32 2147483647, %v1548_v38  ;;  %v495_v42 = vand.u32 2139095040, %v1548_v38  ;;  %v595_v43 = vand.u32 2147483647, %v1550_v39  ;;  %v598_v44 = vand.u32 2139095040, %v1550_v39 }
  0x9e   : > { %v289_v49 = vand.u32 2139095040, %v1552_v40  ;;  %v286_v2 = vand.u32 2147483647, %v1552_v40  ;;  %vm494_vm14 = vcmp.lt.s32.totalorder %v1548_v38, 0  ;;  %vm597_vm15 = vcmp.lt.s32.totalorder %v1550_v39, 0 }
  0x9f   : > { %v496_v45 = vshrl.u32 %v495_v42, 23  ;;  %v499_v46 = vand.u32 8388607, %v492_v41  ;;  %v599_v47 = vshrl.u32 %v598_v44, 23  ;;  %v602_v48 = vand.u32 8388607, %v595_v43 }
  0xa0   : > { %v290_v52 = vshrl.u32 %v289_v49, 23 }
  0xa1   : > { %v1233_v50 = vadd.s32 4294967169, %v496_v45  ;;  %v1237_v51 = vadd.s32 4294967169, %v599_v47  ;;  %v500_v55 = vor.u32 8388608, %v499_v46  ;;  %v603_v56 = vor.u32 8388608, %v602_v48 }
  0xa2   : > { %v1225_v58 = vadd.s32 4294967169, %v290_v52 }
  0xa3   : > { %v502_v53 = vadd.s32 1, %v1233_v50  ;;  %v605_v57 = vadd.s32 1, %v1237_v51  ;;  %v1565_v0 = vshll.u32 %v500_v55, 8  ;;  %v1567_v1 = vshll.u32 %v603_v56, 8 }
  0xa4   : > { %v1570_v3 = vadd.s32 1, %v1225_v58 }
  0xa5   : > { %vm503_vm0 = vcmp.gt.s32.totalorder %v502_v53, 0  ;;  %vm606_vm1 = vcmp.gt.s32.totalorder %v605_v57, 0 }
  0xa6   : > { %v504_v59 = vsel %vm503_vm0, %v502_v53, 0  ;;  %v607_v62 = vsel %vm606_vm1, %v605_v57, 0  ;;  %vm297_vm6 = vcmp.gt.s32.totalorder %v1570_v3, 0 }
  0xa7   : > { %v505_v60 = vshrl.u32 %v504_v59, 5  ;;  %v506_v61 = vand.u32 31, %v504_v59  ;;  %v1573_v7 = vshrl.u32 %v607_v62, 5  ;;  %v609_v8 = vand.u32 31, %v607_v62 }
  0xa9   : > { %v507_v4 = vsub.s32 32, %v506_v61  ;;  %v509_v6 = vshll.u32 %v1447_v5, %v506_v61  ;;  %v512_v10 = vshll.u32 %v1448_v9, %v506_v61  ;;  %v515_v12 = vshll.u32 %v1449_v11, %v506_v61 }
  0xaa   : > { %v518_v14 = vshll.u32 %v1450_v13, %v506_v61  ;;  %v521_v16 = vshll.u32 %v1451_v15, %v506_v61  ;;  %vm524_vm2 = vcmp.lt.s32.totalorder %v505_v60, 1  ;;  %vm525_vm3 = vcmp.lt.s32.totalorder %v505_v60, 2 }
  0xab   : > { %v510_v17 = vshrl.u32 %v1448_v9, %v507_v4  ;;  %v513_v18 = vshrl.u32 %v1449_v11, %v507_v4  ;;  %v516_v19 = vshrl.u32 %v1450_v13, %v507_v4  ;;  %v508_v20 = vshrl.u32 %v1447_v5, %v507_v4 }
  0xac   : > { %v519_v21 = vshrl.u32 %v1451_v15, %v507_v4  ;;  %v522_v23 = vshrl.u32 %v1452_v22, %v507_v4  ;;  %v610_v27 = vsub.s32 32, %v609_v8  ;;  %vm526_vm4 = vcmp.lt.s32.totalorder %v505_v60, 3 }
  0xad   : > { %v511_v24 = vor.u32 %v510_v17, %v509_v6  ;;  %v514_v25 = vor.u32 %v513_v18, %v512_v10  ;;  %v517_v26 = vor.u32 %v516_v19, %v515_v12  ;;  %vm527_vm5 = vcmp.lt.s32.totalorder %v505_v60, 4 }
  0xae   : > { %v520_v28 = vor.u32 %v519_v21, %v518_v14  ;;  %v523_v29 = vor.u32 %v522_v23, %v521_v16  ;;  %v612_v37 = vshll.u32 %v1447_v5, %v609_v8  ;;  %v613_v45 = vshrl.u32 %v1448_v9, %v610_v27 }
  0xaf   : > { %v528_v30 = vsel %vm524_vm2, %v508_v20, %v511_v24  ;;  %v529_v31 = vsel %vm527_vm5, %v517_v26, 2102212464  ;;  %v532_v32 = vsel %vm524_vm2, %v511_v24, %v514_v25  ;;  %v536_v33 = vsel %vm524_vm2, %v514_v25, %v517_v26 }
  0xb0   : > { %v530_v34 = vsel %vm526_vm4, %v514_v25, %v529_v31  ;;  %v533_v35 = vsel %vm527_vm5, %v520_v28, 920167782  ;;  %v537_v36 = vsel %vm527_vm5, %v523_v29, 1326507024  ;;  %v615_v46 = vshll.u32 %v1448_v9, %v609_v8 }
  0xb1   : > { %v534_v42 = vsel %vm526_vm4, %v517_v26, %v533_v35  ;;  %v538_v44 = vsel %vm526_vm4, %v520_v28, %v537_v36  ;;  %v531_v47 = vsel %vm525_vm3, %v528_v30, %v530_v34  ;;  %v616_v50 = vshrl.u32 %v1449_v11, %v610_v27 }
  0xb2   : > { %v535_v48 = vsel %vm525_vm3, %v532_v32, %v534_v42  ;;  %v539_v49 = vsel %vm525_vm3, %v536_v33, %v538_v44  ;;  %v614_v55 = vor.u32 %v613_v45, %v612_v37  ;;  %v618_v57 = vshll.u32 %v1449_v11, %v609_v8 }
  0xb3   : > { %v1597_v51 = vmul.u32.u64.low %v1565_v0, %v539_v49  ;;  %v1598_v52 = vmul.u32.u64.high %v1565_v0, %v539_v49, %v1597_v51  ;;  %v1601_v53 = vmul.u32.u64.low %v1565_v0, %v535_v48  ;;  %v1602_v54 = vmul.u32.u64.high %v1565_v0, %v535_v48, %v1601_v53 }
  0xb4   : > { %v617_v56 = vor.u32 %v616_v50, %v615_v46  ;;  %v619_v58 = vshrl.u32 %v1450_v13, %v610_v27  ;;  %v611_v59 = vshrl.u32 %v1447_v5, %v610_v27  ;;  %v621_v60 = vshll.u32 %v1450_v13, %v609_v8 }
  0xb5   : > { %v622_v61 = vshrl.u32 %v1451_v15, %v610_v27  ;;  %v625_v62 = vshrl.u32 %v1452_v22, %v610_v27  ;;  %v547_v4 = vmul.u32 %v1565_v0, %v531_v47  ;;  %v624_v10 = vshll.u32 %v1451_v15, %v609_v8 }
  0xb6   : > { %v620_v6 = vor.u32 %v619_v58, %v618_v57  ;;  %vm627_vm7 = vcmp.lt.s32.totalorder %v1573_v7, 1  ;;  %vm549_vm8 = vc.u32 %v1598_v52, %v1601_v53  ;;  %v550_v12 = vadd.s32 1, %v1602_v54 }
  0xb7   : > { %v623_v14 = vor.u32 %v622_v61, %v621_v60  ;;  %vm628_vm9 = vcmp.lt.s32.totalorder %v1573_v7, 2  ;;  %v626_v16 = vor.u32 %v625_v62, %v624_v10  ;;  %vm629_vm10 = vcmp.lt.s32.totalorder %v1573_v7, 3 }
  0xb8   : > { %vm630_vm11 = vcmp.lt.s32.totalorder %v1573_v7, 4  ;;  %v635_v17 = vsel %vm627_vm7, %v614_v55, %v617_v56  ;;  %v551_v0 = vsel %vm549_vm8, %v550_v12, %v1602_v54  ;;  %v639_v8 = vsel %vm627_vm7, %v617_v56, %v620_v6 }
  0xb9   : > { %v632_v18 = vsel %vm630_vm11, %v620_v6, 2102212464  ;;  %v636_v19 = vsel %vm630_vm11, %v623_v14, 920167782  ;;  %v552_v20 = vadd.s32 %v551_v0, %v547_v4  ;;  %v631_v21 = vsel %vm627_vm7, %v611_v59, %v614_v55 }
  0xba   : > { %v637_v23 = vsel %vm629_vm10, %v620_v6, %v636_v19  ;;  %v640_v24 = vsel %vm630_vm11, %v626_v16, 1326507024  ;;  %v633_v25 = vsel %vm629_vm10, %v617_v56, %v632_v18  ;;  %v298_v28 = vsel %vm297_vm6, %v1570_v3, 0 }
  0xbb   : > { %v638_v26 = vsel %vm628_vm9, %v635_v17, %v637_v23  ;;  %v641_v27 = vsel %vm629_vm10, %v623_v14, %v640_v24  ;;  %v553_v29 = vadd.s32 536870912, %v552_v20  ;;  %v634_v36 = vsel %vm628_vm9, %v631_v21, %v633_v25 }
  0xbc   : > { %v642_v30 = vsel %vm628_vm9, %v639_v8, %v641_v27  ;;  %v1627_v31 = vmul.u32.u64.low %v1567_v1, %v638_v26  ;;  %v1628_v32 = vmul.u32.u64.high %v1567_v1, %v638_v26, %v1627_v31  ;;  %v293_v3 = vand.u32 8388607, %v286_v2 }
  0xbd   : > { %v1631_v33 = vmul.u32.u64.low %v1567_v1, %v642_v30  ;;  %v1632_v34 = vmul.u32.u64.high %v1567_v1, %v642_v30, %v1631_v33  ;;  %v1634_v35 = vshrl.u32 %v553_v29, 30  ;;  %v300_v37 = vand.u32 31, %v298_v28 }
  0xbe   : > { %v392_v42 = vand.u32 2139095040, %v1563_v63  ;;  %v653_v45 = vadd.s32 1, %v1628_v32  ;;  %v650_v46 = vmul.u32 %v1567_v1, %v634_v36  ;;  %v294_v7 = vor.u32 8388608, %v293_v3 }
  0xbf   : > { %v555_v44 = vshll.u32 %v1634_v35, 30  ;;  %vm652_vm12 = vc.u32 %v1632_v34, %v1627_v31  ;;  %v301_v49 = vsub.s32 32, %v300_v37  ;;  %v1649_v55 = vshrl.u32 %v298_v28, 5 }
  0xc0   : > { %v654_v48 = vsel %vm652_vm12, %v653_v45, %v1628_v32  ;;  %v393_v51 = vshrl.u32 %v392_v42, 23  ;;  %v389_v57 = vand.u32 2147483647, %v1563_v63  ;;  %v548_v58 = vadd.s32 %v1601_v53, %v1598_v52 }
  0xc1   : > { %v1645_v47 = vsub.s32 %v552_v20, %v555_v44  ;;  %v655_v50 = vadd.s32 %v654_v48, %v650_v46  ;;  %v304_v59 = vshrl.u32 %v1448_v9, %v301_v49  ;;  %v1655_v60 = vshll.u32 %v294_v7, 8 }
  0xc2   : > { %v307_v62 = vshrl.u32 %v1449_v11, %v301_v49  ;;  %v310_v4 = vshrl.u32 %v1450_v13, %v301_v49  ;;  %v1229_v6 = vadd.s32 4294967169, %v393_v51  ;;  %v303_v12 = vshll.u32 %v1447_v5, %v300_v37 }
  0xc3   : > { %v558_v54 = vsub.s32 0, %v1645_v47  ;;  %v656_v56 = vadd.s32 536870912, %v655_v50  ;;  %v313_v14 = vshrl.u32 %v1451_v15, %v301_v49  ;;  %vm318_vm13 = vcmp.lt.s32.totalorder %v1649_v55, 1 }
  0xc4   : > { %v306_v53 = vshll.u32 %v1448_v9, %v300_v37  ;;  %v309_v16 = vshll.u32 %v1449_v11, %v300_v37  ;;  %v316_v17 = vshrl.u32 %v1452_v22, %v301_v49  ;;  %v305_v18 = vor.u32 %v304_v59, %v303_v12 }
  0xc5   : > { %v1234_v1 = vmin.u32 %v558_v54, %v1645_v47  ;;  %v657_v61 = vshrl.u32 %v656_v56, 30  ;;  %v312_v19 = vshll.u32 %v1450_v13, %v300_v37  ;;  %vm319_vm0 = vcmp.lt.s32.totalorder %v1649_v55, 2 }
  0xc6   : > { %v308_v20 = vor.u32 %v307_v62, %v306_v53  ;;  %v311_v21 = vor.u32 %v310_v4, %v309_v16  ;;  %v315_v23 = vshll.u32 %v1451_v15, %v300_v37  ;;  %vm320_vm2 = vcmp.lt.s32.totalorder %v1649_v55, 3 }
  0xc7   : > { %v560_v10 = vclz %v1234_v1  ;;  %v658_v52 = vshll.u32 %v657_v61, 30  ;;  %v314_v24 = vor.u32 %v313_v14, %v312_v19  ;;  %vm321_vm3 = vcmp.lt.s32.totalorder %v1649_v55, 4 }
  0xc8   : > { %v578_v26 = vsub.s32 4, %v1634_v35  ;;  %v317_v28 = vor.u32 %v316_v17, %v315_v23  ;;  %vm1678_vm4 = vcmp.le.f32.partialorder %v492_v41, 0.7853982  ;;  %v651_v33 = vadd.s32 %v1627_v31, %v1632_v34 }
  0xc9   : > { %v1235_v0 = vadd.s32 4294967294, %v560_v10  ;;  %v1669_v8 = vsub.s32 %v655_v50, %v658_v52  ;;  %v681_v36 = vsub.s32 4, %v657_v61  ;;  %vm1685_vm5 = vcmp.le.f32.partialorder %v595_v43, 0.7853982 }
  0xca   : > { %v302_v42 = vshrl.u32 %v1447_v5, %v301_v49  ;;  %v323_v41 = vsel %vm321_vm3, %v311_v21, 2102212464  ;;  %v326_v44 = vsel %vm318_vm13, %v305_v18, %v308_v20  ;;  %v327_v43 = vsel %vm321_vm3, %v314_v24, 920167782 }
  0xcb   : > { %vm1236_vm1 = vcmp.lt.s32.totalorder %v1235_v0, 0  ;;  %v661_v27 = vsub.s32 0, %v1669_v8  ;;  %v328_v48 = vsel %vm320_vm2, %v311_v21, %v327_v43  ;;  %v330_v7 = vsel %vm318_vm13, %v308_v20, %v311_v21 }
  0xcc   : > { %v563_v25 = vsel %vm1236_vm1, 0, %v1235_v0  ;;  %v331_v49 = vsel %vm321_vm3, %v317_v28, 1326507024  ;;  %v682_v54 = vsel %vm597_vm15, %v681_v36, %v657_v61  ;;  %v329_v1 = vsel %vm319_vm0, %v326_v44, %v328_v48 }
  0xcd   : > { %v564_v30 = vsub.s32 32, %v563_v25  ;;  %v568_v32 = vsub.s32 4294967266, %v563_v25  ;;  %v1238_v37 = vmin.u32 %v661_v27, %v1669_v8  ;;  %v565_v45 = vshll.u32 %v1645_v47, %v563_v25 }
  0xce   : > { %v579_v47 = vsel %vm494_vm14, %v578_v26, %v1634_v35  ;;  %v332_v59 = vsel %vm320_vm2, %v314_v24, %v331_v49  ;;  %v324_v10 = vsel %vm320_vm2, %v308_v20, %v323_v41  ;;  %v399_v14 = vadd.s32 1, %v1229_v6 }
  0xcf   : > { %v566_v31 = vshrl.u32 %v548_v58, %v564_v30  ;;  %v569_v34 = vadd.s32 127, %v568_v32  ;;  %v663_v46 = vclz %v1238_v37  ;;  %v322_v58 = vsel %vm318_vm13, %v302_v42, %v305_v18 }
  0xd0   : > { %v333_v35 = vsel %vm319_vm0, %v330_v7, %v332_v59  ;;  %v1724_v16 = vmul.u32.u64.low %v1655_v60, %v329_v1  ;;  %v1725_v17 = vmul.u32.u64.high %v1655_v60, %v329_v1, %v1724_v16  ;;  %v581_v0 = vsel %vm1678_vm4, 0, %v579_v47 }
  0xd1   : > { %v567_v50 = vor.u32 %v566_v31, %v565_v45  ;;  %v570_v51 = vshll.u32 %v569_v34, 23  ;;  %v1239_v56 = vadd.s32 4294967294, %v663_v46  ;;  %vm400_vm7 = vcmp.gt.s32.totalorder %v399_v14, 0 }
  0xd2   : > { %v1720_v61 = vmul.u32.u64.low %v1655_v60, %v333_v35  ;;  %v1721_v12 = vmul.u32.u64.high %v1655_v60, %v333_v35, %v1720_v61  ;;  %v684_v21 = vsel %vm1685_vm5, 0, %v682_v54  ;;  %v325_v6 = vsel %vm319_vm0, %v322_v58, %v324_v10 }
  0xd3   : > { %v571_v62 = vor.u32 4788187, %v570_v51  ;;  %v574_v4 = vcvt.s32.f32 %v567_v50  ;;  %vm1240_vm6 = vcmp.lt.s32.totalorder %v1239_v56, 0  ;;  %v401_v23 = vsel %vm400_vm7, %v399_v14, 0 }
  0xd4   : > { %v666_v53 = vsel %vm1240_vm6, 0, %v1239_v56  ;;  %vm343_vm8 = vc.u32 %v1721_v12, %v1724_v16  ;;  %v1003_v28 = vadd.s32 3, %v581_v0  ;;  %v344_v30 = vadd.s32 1, %v1725_v17 }
  0xd5   : > { %v572_v52 = vand.u32 2147483647, %v571_v62  ;;  %v667_v18 = vsub.s32 32, %v666_v53  ;;  %v671_v19 = vsub.s32 4294967266, %v666_v53  ;;  %v668_v24 = vshll.u32 %v1669_v8, %v666_v53 }
  0xd6   : > { %v403_v32 = vand.u32 31, %v401_v23  ;;  %v341_v42 = vmul.u32 %v1655_v60, %v325_v6  ;;  %v396_v55 = vand.u32 8388607, %v389_v57  ;;  %v345_v41 = vsel %vm343_vm8, %v344_v30, %v1725_v17 }
  0xd7   : > { %v575_v20 = vmul.f32 %v574_v4, %v572_v52  ;;  %v669_v25 = vshrl.u32 %v651_v33, %v667_v18  ;;  %v672_v26 = vadd.s32 127, %v671_v19  ;;  %v1107_v33 = vadd.s32 3, %v684_v21 }
  0xd8   : > { %v404_v44 = vsub.s32 32, %v403_v32  ;;  %v346_v34 = vadd.s32 %v345_v41, %v341_v42  ;;  %v1747_v43 = vand.u32 3, %v581_v0  ;;  %v1749_v60 = vand.u32 3, %v1003_v28 }
  0xd9   : > { %v576_v27 = vxor.u32 2147483648, %v575_v20  ;;  %v670_v36 = vor.u32 %v669_v25, %v668_v24  ;;  %v673_v37 = vshll.u32 %v672_v26, 23  ;;  %v1751_v49 = vand.u32 3, %v684_v21 }
  0xda   : > { %v347_v7 = vadd.s32 536870912, %v346_v34  ;;  %v1753_v50 = vand.u32 3, %v1107_v33  ;;  %v397_v51 = vor.u32 8388608, %v396_v55  ;;  %v407_v47 = vshrl.u32 %v1448_v9, %v404_v44 }
  0xdb   : > { %v577_v8 = vsel %vm494_vm14, %v576_v27, %v575_v20  ;;  %v674_v31 = vor.u32 4788187, %v673_v37  ;;  %v677_v48 = vcvt.s32.f32 %v670_v36  ;;  %v410_v56 = vshrl.u32 %v1449_v11, %v404_v44 }
  0xdc   : > { %v580_v45 = vsel %vm1678_vm4, %v1548_v38, %v577_v8  ;;  %v1756_v54 = vshrl.u32 %v347_v7, 30  ;;  %v416_v58 = vshrl.u32 %v1451_v15, %v404_v44  ;;  %vm590_vm9 = vcmp.eq.s32.totalorder %v1747_v43, 2 }
  0xdd   : > { %1349 = vcosq.f32 %v580_v45  ;;  %v675_v46 = vand.u32 2147483647, %v674_v31  ;;  %vm1009_vm10 = vcmp.eq.s32.totalorder %v1749_v60, 2  ;;  %v1762_v1 = vshrl.u32 %v401_v23, 5 }
  0xde   : > { %1351 = vsinq.f32 %v580_v45  ;;  %v413_v59 = vshrl.u32 %v1450_v13, %v404_v44  ;;  %v415_v62 = vshll.u32 %v1450_v13, %v403_v32  ;;  %v419_v4 = vshrl.u32 %v1452_v22, %v404_v44 }
  0xdf   : > { %v678_v29 = vmul.f32 %v677_v48, %v675_v46  ;;  %vm587_vm11 = vcmp.eq.s32.totalorder %v1747_v43, 0  ;;  %vm1006_vm12 = vcmp.eq.s32.totalorder %v1749_v60, 0  ;;  %v349_v35 = vshll.u32 %v1756_v54, 30 }
  0xe0   : > { %v406_v61 = vshll.u32 %v1447_v5, %v403_v32  ;;  %v409_v14 = vshll.u32 %v1448_v9, %v403_v32  ;;  %vm586_vm13 = vcmp.lt.s32.totalorder %v1747_v43, 2  ;;  %vm1005_vm14 = vcmp.lt.s32.totalorder %v1749_v60, 2 }
  0xe1   : > { %v679_v10 = vxor.u32 2147483648, %v678_v29  ;;  %v412_v13 = vshll.u32 %v1449_v11, %v403_v32  ;;  %v417_v52 = vor.u32 %v416_v58, %v415_v62  ;;  %v418_v22 = vshll.u32 %v1451_v15, %v403_v32 }
  0xe2   : > { %v1776_v53 = vshll.u32 %v397_v51, 8  ;;  %vm584_vm0 = vweird.f32 %v1548_v38  ;;  %v1781_v0 = vsub.s32 %v346_v34, %v349_v35  ;;  %v408_v18 = vor.u32 %v407_v47, %v406_v61 }
  0xe3   : > { %v680_v17 = vsel %vm597_vm15, %v679_v10, %v678_v29  ;;  %v411_v9 = vor.u32 %v410_v56, %v409_v14  ;;  %v405_v19 = vshrl.u32 %v1447_v5, %v404_v44  ;;  %v414_v15 = vor.u32 %v413_v59, %v412_v13 }
  0xe4   : > { %v683_v11 = vsel %vm1685_vm5, %v1550_v39, %v680_v17  ;;  %v420_v20 = vor.u32 %v419_v4, %v418_v22  ;;  %v352_v21 = vsub.s32 0, %v1781_v0  ;;  %vm421_vm1 = vcmp.lt.s32.totalorder %v1762_v1, 1 }
  0xe5   : > { %1353 = vcosq.f32 %v683_v11  ;;  %vm424_vm15 = vcmp.lt.s32.totalorder %v1762_v1, 4  ;;  %vm422_vm2 = vcmp.lt.s32.totalorder %v1762_v1, 2  ;;  %vm423_vm3 = vcmp.lt.s32.totalorder %v1762_v1, 3 }
  0xe6   : > { %1355 = vsinq.f32 %v683_v11  ;;  %v430_v3 = vsel %vm424_vm15, %v417_v52, 920167782  ;;  %v1226_v24 = vmin.u32 %v352_v21, %v1781_v0  ;;  %v425_v25 = vsel %vm421_vm1, %v405_v19, %v408_v18 }
  0xe7   : > { %v1350_v6 = vpop.eup %1349  ;;  %v429_v26 = vsel %vm421_vm1, %v408_v18, %v411_v9  ;;  %v431_v28 = vsel %vm423_vm3, %v414_v15, %v430_v3  ;;  %v433_v30 = vsel %vm421_vm1, %v411_v9, %v414_v15  ;;  %v434_v32 = vsel %vm424_vm15, %v420_v20, 1326507024 }
  0xe8   : > { %v1352_v23 = vpop.eup %1351  ;;  %v591_v5 = vxor.u32 2147483648, %v1350_v6  ;;  %v354_v42 = vclz %v1226_v24  ;;  %v426_v55 = vsel %vm424_vm15, %v414_v15, 2102212464  ;;  %v432_v41 = vsel %vm422_vm2, %v429_v26, %v431_v28 }
  0xe9   : > { %v588_v27 = vxor.u32 2147483648, %v1352_v23  ;;  %v435_v44 = vsel %vm423_vm3, %v417_v52, %v434_v32  ;;  %vm687_vm4 = vweird.f32 %v1550_v39  ;;  %v427_v43 = vsel %vm423_vm3, %v411_v9, %v426_v55 }
  0xea   : > { %v592_v36 = vsel %vm590_vm9, %v591_v5, %v1352_v23  ;;  %v1011_v37 = vsel %vm1009_vm10, %v591_v5, %v1352_v23  ;;  %v1227_v34 = vadd.s32 4294967294, %v354_v42  ;;  %v436_v46 = vsel %vm422_vm2, %v433_v30, %v435_v44 }
  0xeb   : > { %v589_v8 = vsel %vm587_vm11, %v1350_v6, %v588_v27  ;;  %v1008_v33 = vsel %vm1006_vm12, %v1350_v6, %v588_v27  ;;  %v1828_v51 = vmul.u32.u64.low %v1776_v53, %v436_v46  ;;  %v1829_v47 = vmul.u32.u64.high %v1776_v53, %v436_v46, %v1828_v51 }
  0xec   : > { %v593_v45 = vsel %vm586_vm13, %v589_v8, %v592_v36  ;;  %v1012_v31 = vsel %vm1005_vm14, %v1008_v33, %v1011_v37  ;;  %vm1228_vm5 = vcmp.lt.s32.totalorder %v1227_v34, 0  ;;  %vm689_vm6 = vcmp.lt.s32.totalorder %v1751_v49, 2 }
  0xed   : > { %v594_v48 = vsel %vm584_vm0, nan, %v593_v45  ;;  %v1013_v7 = vsel %vm584_vm0, nan, %v1012_v31  ;;  %v1838_v60 = vmul.u32.u64.low %v1776_v53, %v432_v41  ;;  %v1839_v29 = vmul.u32.u64.high %v1776_v53, %v432_v41, %v1838_v60 }
  0xee   : > { %700 = vst [vmem:[%s1831_s21 + $0x10] sm:$0xff] %v594_v48  ;;  %1120 = vst [vmem:[%s1831_s21 + $0x30] sm:$0xff] %v1013_v7  ;;  %vm690_vm7 = vcmp.eq.s32.totalorder %v1751_v49, 0  ;;  %vm693_vm8 = vcmp.eq.s32.totalorder %v1751_v49, 2  ;;  %v357_v38 = vsel %vm1228_vm5, 0, %v1227_v34  ;;  %vm1113_vm9 = vcmp.eq.s32.totalorder %v1753_v50, 2 }
  0xef   : > { %v1354_v56 = vpop.eup %1353  ;;  %v342_v58 = vadd.s32 %v1724_v16, %v1721_v12  ;;  %v358_v59 = vsub.s32 32, %v357_v38  ;;  %v362_v62 = vsub.s32 4294967266, %v357_v38  ;;  %v359_v35 = vshll.u32 %v1781_v0, %v357_v38 }
  0xf0   : > { %v1356_v4 = vpop.eup %1355  ;;  %v694_v10 = vxor.u32 2147483648, %v1354_v56  ;;  %v428_v61 = vsel %vm422_vm2, %v425_v25, %v427_v43  ;;  %vm446_vm10 = vc.u32 %v1829_v47, %v1838_v60  ;;  %v447_v22 = vadd.s32 1, %v1839_v29 }
  0xf1   : > { %v691_v14 = vxor.u32 2147483648, %v1356_v4  ;;  %v360_v13 = vshrl.u32 %v342_v58, %v358_v59  ;;  %v363_v52 = vadd.s32 127, %v362_v62  ;;  %vm1109_vm11 = vcmp.lt.s32.totalorder %v1753_v50, 2 }
  0xf2   : > { %v695_v12 = vsel %vm693_vm8, %v694_v10, %v1356_v4  ;;  %vm1110_vm12 = vcmp.eq.s32.totalorder %v1753_v50, 0  ;;  %v1115_v16 = vsel %vm1113_vm9, %v694_v10, %v1356_v4  ;;  %v444_v19 = vmul.u32 %v1776_v53, %v428_v61 }
  0xf3   : > { %v692_v1 = vsel %vm690_vm7, %v1354_v56, %v691_v14  ;;  %v1112_v17 = vsel %vm1110_vm12, %v1354_v56, %v691_v14  ;;  %v361_v0 = vor.u32 %v360_v13, %v359_v35  ;;  %v364_v18 = vshll.u32 %v363_v52, 23 }
  0xf4   : > { %v696_v9 = vsel %vm689_vm6, %v692_v1, %v695_v12  ;;  %v1116_v11 = vsel %vm1109_vm11, %v1112_v17, %v1115_v16  ;;  %v448_v15 = vsel %vm446_vm10, %v447_v22, %v1839_v29  ;;  %v372_v53 = vsub.s32 4, %v1756_v54 }
  0xf5   : > { %v697_v50 = vsel %vm687_vm4, nan, %v696_v9  ;;  %v1117_v20 = vsel %vm687_vm4, nan, %v1116_v11  ;;  %v365_v21 = vor.u32 4788187, %v364_v18  ;;  %v449_v6 = vadd.s32 %v448_v15, %v444_v19 }
  0xf6   : > { %701 = vst [vmem:[%s1831_s21 + $0x18] sm:$0xff] %v697_v50  ;;  %1121 = vst [vmem:[%s1831_s21 + $0x38] sm:$0xff] %v1117_v20  ;;  %v368_v3 = vcvt.s32.f32 %v361_v0  ;;  %vm288_vm13 = vcmp.lt.s32.totalorder %v1552_v40, 0  ;;  %vm287_vm14 = vcmp.le.f32.partialorder %v286_v2, 0.7853982  ;;  %vm378_vm1 = vweird.f32 %v1552_v40 }
  0xf7   : > { %v366_v49 = vand.u32 2147483647, %v365_v21  ;;  %v450_v23 = vadd.s32 536870912, %v449_v6  ;;  %v373_v27 = vsel %vm288_vm13, %v372_v53, %v1756_v54  ;;  %v445_v31 = vadd.s32 %v1838_v60, %v1829_v47 }
  0xf8   : > { %v375_v32 = vsel %vm287_vm14, 0, %v373_v27  ;;  %vm391_vm7 = vcmp.lt.s32.totalorder %v1563_v63, 0  ;;  %vm390_vm8 = vcmp.le.f32.partialorder %v389_v57, 0.7853982 }
  0xf9   : > { %v369_v5 = vmul.f32 %v368_v3, %v366_v49  ;;  %v451_v24 = vshrl.u32 %v450_v23, 30  ;;  %v795_v42 = vadd.s32 3, %v375_v32  ;;  %v379_v8 = vand.u32 3, %v375_v32 }
  0xfb   : > { %v370_v25 = vxor.u32 2147483648, %v369_v5  ;;  %v452_v26 = vshll.u32 %v451_v24, 30  ;;  %v796_v41 = vand.u32 3, %v795_v42  ;;  %vm381_vm15 = vcmp.eq.s32.totalorder %v379_v8, 0 }
  0xfc   : > { %vm384_vm2 = vcmp.eq.s32.totalorder %v379_v8, 2  ;;  %vm380_vm5 = vcmp.lt.s32.totalorder %v379_v8, 2  ;;  %v475_v52 = vsub.s32 4, %v451_v24 }
  0xfd   : > { %v371_v39 = vsel %vm288_vm13, %v370_v25, %v369_v5  ;;  %v453_v30 = vsub.s32 %v449_v6, %v452_v26  ;;  %vm798_vm3 = vcmp.eq.s32.totalorder %v796_v41, 0  ;;  %vm801_vm4 = vcmp.eq.s32.totalorder %v796_v41, 2 }
  0xfe   : > { %v374_v28 = vsel %vm287_vm14, %v1552_v40, %v371_v39  ;;  %vm797_vm6 = vcmp.lt.s32.totalorder %v796_v41, 2  ;;  %v476_v16 = vsel %vm391_vm7, %v475_v52, %v451_v24 }
  0xff   : > { %1357 = vcosq.f32 %v374_v28  ;;  %v455_v36 = vsub.s32 0, %v453_v30  ;;  %v478_v1 = vsel %vm390_vm8, 0, %v476_v16 }
 0x100   : > { %1359 = vsinq.f32 %v374_v28  ;;  %v899_v17 = vadd.s32 3, %v478_v1  ;;  %v482_v0 = vand.u32 3, %v478_v1 }
 0x101   : > { %v1230_v37 = vmin.u32 %v455_v36, %v453_v30 }
 0x102   : > { %v900_v18 = vand.u32 3, %v899_v17  ;;  %vm487_vm9 = vcmp.eq.s32.totalorder %v482_v0, 2  ;;  %vm484_vm11 = vcmp.eq.s32.totalorder %v482_v0, 0  ;;  %vm483_vm13 = vcmp.lt.s32.totalorder %v482_v0, 2 }
 0x103   : > { %v457_v55 = vclz %v1230_v37 }
 0x104   : > { %vm905_vm10 = vcmp.eq.s32.totalorder %v900_v18, 2  ;;  %vm902_vm12 = vcmp.eq.s32.totalorder %v900_v18, 0  ;;  %vm901_vm14 = vcmp.lt.s32.totalorder %v900_v18, 2 }
 0x105   : > { %v1231_v33 = vadd.s32 4294967294, %v457_v55 }
 0x107   : > { %vm1232_vm0 = vcmp.lt.s32.totalorder %v1231_v33, 0 }
 0x108   : > { %v460_v2 = vsel %vm1232_vm0, 0, %v1231_v33  ;;  %vm481_vm0 = vweird.f32 %v1563_v63 }
 0x109   : > { %v1358_v44 = vpop.eup %1357  ;;  %v461_v34 = vsub.s32 32, %v460_v2  ;;  %v465_v46 = vsub.s32 4294967266, %v460_v2  ;;  %v462_v7 = vshll.u32 %v453_v30, %v460_v2 }
 0x10a   : > { %v1360_v54 = vpop.eup %1359  ;;  %v385_v45 = vxor.u32 2147483648, %v1358_v44 }
 0x10b   : > { %v382_v48 = vxor.u32 2147483648, %v1360_v54  ;;  %v463_v43 = vshrl.u32 %v445_v31, %v461_v34  ;;  %v466_v29 = vadd.s32 127, %v465_v46 }
 0x10c   : > { %v386_v51 = vsel %vm384_vm2, %v385_v45, %v1360_v54  ;;  %v803_v38 = vsel %vm801_vm4, %v385_v45, %v1360_v54 }
 0x10d   : > { %v383_v56 = vsel %vm381_vm15, %v1358_v44, %v382_v48  ;;  %v800_v58 = vsel %vm798_vm3, %v1358_v44, %v382_v48  ;;  %v464_v62 = vor.u32 %v463_v43, %v462_v7  ;;  %v467_v47 = vshll.u32 %v466_v29, 23 }
 0x10e   : > { %v387_v59 = vsel %vm380_vm5, %v383_v56, %v386_v51  ;;  %v804_v60 = vsel %vm797_vm6, %v800_v58, %v803_v38 }
 0x10f   : > { %v388_v4 = vsel %vm378_vm1, nan, %v387_v59  ;;  %v805_v10 = vsel %vm378_vm1, nan, %v804_v60  ;;  %v468_v35 = vor.u32 4788187, %v467_v47  ;;  %v471_v14 = vcvt.s32.f32 %v464_v62 }
 0x110   : > { %698 = vst [vmem:[%s1831_s21] sm:$0xff] %v388_v4  ;;  %1118 = vst [vmem:[%s1831_s21 + $0x20] sm:$0xff] %v805_v10 }
 0x111   : > { %v469_v61 = vand.u32 2147483647, %v468_v35 }
 0x113   : > { %v472_v13 = vmul.f32 %v471_v14, %v469_v61 }
 0x115   : > { %v473_v22 = vxor.u32 2147483648, %v472_v13 }
 0x117   : > { %v474_v12 = vsel %vm391_vm7, %v473_v22, %v472_v13 }
 0x118   : > { %v477_v40 = vsel %vm390_vm8, %v1563_v63, %v474_v12 }
 0x119   : > { %1361 = vcosq.f32 %v477_v40 }
 0x11a   : > { %1363 = vsinq.f32 %v477_v40 }
 0x123   : > { %v1362_v9 = vpop.eup %1361 }
 0x124   : > { %v1364_v11 = vpop.eup %1363  ;;  %v488_v19 = vxor.u32 2147483648, %v1362_v9 }
 0x125   : > { %v485_v15 = vxor.u32 2147483648, %v1364_v11 }
 0x126   : > { %v489_v57 = vsel %vm487_vm9, %v488_v19, %v1364_v11  ;;  %v907_v50 = vsel %vm905_vm10, %v488_v19, %v1364_v11 }
 0x127   : > { %v486_v20 = vsel %vm484_vm11, %v1362_v9, %v485_v15  ;;  %v904_v21 = vsel %vm902_vm12, %v1362_v9, %v485_v15 }
 0x128   : > { %v490_v6 = vsel %vm483_vm13, %v486_v20, %v489_v57  ;;  %v908_v49 = vsel %vm901_vm14, %v904_v21, %v907_v50 }
 0x129   : > { %v491_v3 = vsel %vm481_vm0, nan, %v490_v6  ;;  %v909_v23 = vsel %vm481_vm0, nan, %v908_v49 }
 0x12a   : > { %699 = vst [vmem:[%s1831_s21 + $0x8] sm:$0xff] %v491_v3  ;;  %1119 = vst [vmem:[%s1831_s21 + $0x28] sm:$0xff] %v909_v23 }
 0x12b   : > { %1378 = shalt.err (!%p1375_p5)
}
 0x12c   : > { %s1379_s7 = scalar_lea.hbm %s1900_s15, 1024  ;;  %s1383_s10 = scalar_lea.hbm %s1958_s3, 2048 }
 0x12d   : > { %p1380_p6 = scmp.ne.s32.totalorder %s1900_s15, %s1379_s7  ;;  %p1384_p10 = scmp.lt.u32.totalorder %s1900_s15, %s1958_s3 }
 0x12e   : > { %p1385_p11 = scmp.lt.u32.totalorder %s1383_s10, %s1379_s7  ;;  %p1387_p13 = scmp.lt.u32.totalorder %s1379_s7, %s1900_s15 }
 0x12f   : > { %p1381_p7 = pnand %p1380_p6, %p1516_p4 }
 0x130   : > { %p1386_p12 = por %p1385_p11, %p1384_p10 }
 0x131   : > { %p1382_p9 = pneg %p1381_p7 }
 0x132   : > { %p1388_p0 = por %p1387_p13, %p1386_p12 }
 0x134   : > { %p1389_p1 = pnand %p1388_p0, %p1382_p9 }
 0x136   : > { %1392 = shalt.err (!%p1389_p1)
}
 0x137   : > { %s1454_s19 = smov 256   ;;  %s1455_s21 = smov 16  }
 0x138   : > { %1280 = dma.vmem_to_hbm [thread:$0]  (%p1516_p4), %s1902_s26, 1024, %s1900_s15, %s1909_s29, %s1454_s19, %s1454_s19, %s1455_s21  }
 0x139 PF: > { %p1286_p2 = scmp.ge.s32.totalorder %s1443_s17, 2  ;;  %s1153_s23 = sand.u32 1, %s1423_s12  }
 0x13a   : > { %s1154_s27 = scalar_lea.sflag [#allocation3], %s1153_s23 }
 0x13b   : > { %p1283_p3 = pnand %p1286_p2, %p1523_p8 }
 0x13d   : > { %1418 = dma.done.wait (!%p1283_p3), %s1154_s27, 1024  }
 0x13e   : > { %1420 = vsyncadd (!%p1283_p3), %s1154_s27, 4294966272  ;;  %s16_s17 = sadd.s32 1, %s1443_s17   ;;  %s1965_s12 = smov %s1427_s13 }
 0x13f   : > { %p13_p5 = scmp.ge.s32.totalorder %s16_s17, 4   ;;  %s1966_s13 = smov %s1431_s14 }
 0x140   : > { %s1967_s14 = smov %s1529_s25  ;;  %s1968_s15 = smov %s1439_s16 }
 0x141   : > { %s1969_s16 = smov %s1971_s20  ;;  %15 = sbr.rel (!%p13_p5) target bundleno = 4 (0x4), region = 67 }
 0x148   :  { %1159 = vsyncpa [#allocation3], 1 }
 0x149   :  { %1161 = vsyncpa [#allocation3 + $0x1], 1 }

</bundles_post_ra>
